<compile_context>
chip_gen: v7x
topology: tpu7x:2x2x1
jax: 0.10.0
libtpu: 0.0.40
codegen_flags: <defaults>
</compile_context>

<pallas_src>
import math
import numpy as np
import jax
import jax.numpy as jnp
from jax.experimental import pallas as pl
from jax.experimental.pallas import tpu as pltpu

PI = math.pi

_PRIMES = [2, 3, 5, 7, 11, 13, 17, 19, 23, 29, 31, 37, 41, 43, 47, 53, 59, 61,
           67, 71, 73, 79, 83, 89, 97, 101, 103, 107, 109, 113, 127, 131, 137,
           139, 149, 151, 157, 163, 167, 173, 179, 181, 191, 193, 197, 199]


def _parse_name(name: str) -> float:
    return float(name.split('_')[1])


def build_gpe_prime_frequencies(name: str, dim: int = 128) -> np.ndarray:
    """Replicates bGPEPrime.__init__ frequency construction (concat of self.ws)."""
    assert dim % 4 == 0
    e = _parse_name(name)
    primes = list(_PRIMES)
    jz_len = [1]
    ws = [np.ones(1, dtype=np.float64) / 180.0 * PI]
    while True:
        p = primes.pop(0)
        le = int(np.ceil(-np.log(e) / np.log(p)))
        le = max(le, 1)
        le = min(le, dim // 4 - sum(jz_len))
        ws.append(np.array([p ** (i + 1) for i in range(le)], dtype=np.float64)
                  / 180.0 * PI)
        jz_len.append(le)
        if sum(jz_len) >= dim // 4:
            break
    w = np.concatenate(ws).astype(np.float32)
    assert w.shape[0] == dim // 4
    return w


def _round_up(x: int, m: int) -> int:
    return ((x + m - 1) // m) * m


def build_gpe_prime_const_rows(w: np.ndarray, dim: int) -> np.ndarray:
    """Per-feature constant rows, selectors/phase folded host-side.

    Row 0: w_rep   (frequency for every output feature; tile of w, 4x)
    Row 1: phase   (0 for sin features, pi/2 for cos features: cos(x)=sin(x+pi/2))
    Row 2: is_lon  (1.0 where the feature uses lon, 0.0 where it uses lat)
    """
    d4 = dim // 4
    w_rep = np.tile(w.astype(np.float64), 4)                        # (dim,)
    is_lon = np.concatenate([np.ones(2 * d4), np.zeros(2 * d4)])    # lon,lon,lat,lat
    is_sin = np.concatenate([np.ones(d4), np.zeros(d4),
                             np.ones(d4), np.zeros(d4)])            # sin,cos,sin,cos
    phase = (1.0 - is_sin) * (PI / 2.0)
    return np.stack([w_rep, phase, is_lon]).astype(np.float32)      # (3, dim)


# ----------------------------- Pallas kernel ------------------------------


def _gpe_kernel(t_ref, c_ref, out_ref):
    t = t_ref[...]                      # (tile, 2)  columns = (lat, lon)
    lat = t[:, 0:1]                     # (tile, 1)
    lon = t[:, 1:2]                     # (tile, 1)

    c = c_ref[...]                      # (3, dim)  constant rows (fetched once)
    w_rep = c[0:1, :]                   # (1, dim)
    phase = c[1:2, :]                   # (1, dim)
    use_lon = c[2:3, :] > 0.5           # (1, dim)  bool; one tiny vreg cmp/step

    # select + mul + add (3 VALU ops/elem) then a single sin per element.
    coord = jnp.where(use_lon, lon, lat)            # (tile, dim)
    out_ref[...] = jnp.sin(coord * w_rep + phase)


def gpe_prime_forward(T: jnp.ndarray, w: np.ndarray, dim: int,
                      tile_n: int = 4096) -> jnp.ndarray:
    """T: (bs, n, 2) or (n, 2) float32 -> (bs, n, dim) or (n, dim)."""
    assert dim % 4 == 0, "dim must be a multiple of 4 (as in bGPEPrime)"
    batched = T.ndim == 3
    T2 = T.reshape(-1, 2).astype(jnp.float32)
    N = T2.shape[0]

    consts = jnp.asarray(build_gpe_prime_const_rows(np.asarray(w), dim))  # (3, dim)

    # Row tile: large for throughput, clamped to a multiple of 8 for tiny N,
    # and clamped so the grid has >= 2 steps for non-trivial N (keeps both
    # v7x TensorCores busy via the "parallel" grid axis).
    tile = max(8, min(_round_up(tile_n, 8), _round_up(N, 8)))
    if N > 8 and pl.cdiv(N, tile) < 2:
        tile = max(8, _round_up(pl.cdiv(N, 2), 8))
    grid = (pl.cdiv(N, tile),)

    out = pl.pallas_call(
        _gpe_kernel,
        out_shape=jax.ShapeDtypeStruct((N, dim), jnp.float32),
        grid_spec=pltpu.PrefetchScalarGridSpec(
            num_scalar_prefetch=0,
            grid=grid,
            in_specs=[
                # (lat, lon) rows; last block is ragged when N % tile != 0.
                pl.BlockSpec((tile, 2), lambda i: (i, 0)),
                # Constant rows; constant index map -> not re-DMA'd per step.
                pl.BlockSpec((3, dim), lambda i: (0, 0)),
            ],
            out_specs=pl.BlockSpec((tile, dim), lambda i: (i, 0)),
        ),
        compiler_params=pltpu.CompilerParams(
            dimension_semantics=("parallel",),
            vmem_limit_bytes=32 * 1024 * 1024),
    )(T2, consts)

    if batched:
        out = out.reshape(T.shape[0], T.shape[1], dim)
    return out


# ------------------------------- reference --------------------------------


def gpe_prime_reference(T: jnp.ndarray, w: np.ndarray, dim: int) -> jnp.ndarray:
    batched = T.ndim == 3
    T2 = T.reshape(-1, 2)
    lat, lon = T2[:, 0], T2[:, 1]
    wj = jnp.asarray(w, dtype=jnp.float32)
    wlon = lon[:, None] * wj[None, :]
    wlat = lat[:, None] * wj[None, :]
    sc = jnp.concatenate(
        [jnp.sin(wlon), jnp.cos(wlon), jnp.sin(wlat), jnp.cos(wlat)], axis=-1)
    if batched:
        sc = sc.reshape(T.shape[0], T.shape[1], dim)
    return sc


if __name__ == "__main__":
    name = "bGPEPrime_0.01"   # e = 0.01
    dim = 128                 # default (dim % 4 == 0)

    w = build_gpe_prime_frequencies(name, dim=dim)

    key = jax.random.PRNGKey(0)

    # Case 1: small batched input (bs=2, n=8 points, (lat, lon) in degrees).
    T = jax.random.uniform(key, (2, 8, 2), dtype=jnp.float32,
                           minval=-90.0, maxval=90.0)
    out = jax.block_until_ready(gpe_prime_forward(T, w, dim))
    ref = gpe_prime_reference(T, w, dim)
    np.testing.assert_allclose(np.asarray(out), np.asarray(ref),
                               rtol=1e-4, atol=5e-4)
    assert out.shape == (2, 8, dim) and out.dtype == jnp.float32

    # Case 2: unbatched, N not a multiple of the row tile (exercises the
    # ragged final block path that replaced the pad/slice round trip).
    key2 = jax.random.PRNGKey(1)
    T13 = jax.random.uniform(key2, (13, 2), dtype=jnp.float32,
                             minval=-90.0, maxval=90.0)
    out13 = jax.block_until_ready(gpe_prime_forward(T13, w, dim))
    ref13 = gpe_prime_reference(T13, w, dim)
    np.testing.assert_allclose(np.asarray(out13), np.asarray(ref13),
                               rtol=1e-4, atol=5e-4)
    assert out13.shape == (13, dim) and out13.dtype == jnp.float32

    print("KERNEL_OK")
</pallas_src>

<mosaic_0001>
module attributes {stable_mosaic.version = 11 : i64} {
  func.func @_gpe_kernel(%arg0: i32, %arg1: memref<8x2xf32, #tpu.memory_space<vmem>>, %arg2: memref<3x128xf32, #tpu.memory_space<vmem>>, %arg3: memref<8x128xf32, #tpu.memory_space<vmem>>) attributes {dimension_semantics = [#tpu.dimension_semantics<parallel>], iteration_bounds = array<i64: 2>, scalar_prefetch = 0 : i64, scratch_operands = 0 : i64, tpu.core_type = #tpu.core_type<tc>, window_params = [{transform_indices = @transform_0, window_bounds = array<i64: 8, 2>}, {pipeline_mode = #tpu.pipeline_mode<synchronous>, transform_indices = @transform_1, window_bounds = array<i64: 3, 128>}, {transform_indices = @transform_2, window_bounds = array<i64: 8, 128>}]} {
    %c0 = arith.constant 0 : index
    %c0_0 = arith.constant 0 : index
    %0 = vector.load %arg1[%c0, %c0_0] : memref<8x2xf32, #tpu.memory_space<vmem>>, vector<8x2xf32>
    %1 = vector.extract_strided_slice %0 {offsets = [0, 0], sizes = [8, 1], strides = [1, 1]} : vector<8x2xf32> to vector<8x1xf32>
    %2 = vector.extract_strided_slice %0 {offsets = [0, 1], sizes = [8, 1], strides = [1, 1]} : vector<8x2xf32> to vector<8x1xf32>
    %c0_1 = arith.constant 0 : index
    %c0_2 = arith.constant 0 : index
    %3 = vector.load %arg2[%c0_1, %c0_2] : memref<3x128xf32, #tpu.memory_space<vmem>>, vector<3x128xf32>
    %4 = vector.extract_strided_slice %3 {offsets = [0, 0], sizes = [1, 128], strides = [1, 1]} : vector<3x128xf32> to vector<1x128xf32>
    %5 = vector.extract_strided_slice %3 {offsets = [1, 0], sizes = [1, 128], strides = [1, 1]} : vector<3x128xf32> to vector<1x128xf32>
    %6 = vector.extract_strided_slice %3 {offsets = [2, 0], sizes = [1, 128], strides = [1, 1]} : vector<3x128xf32> to vector<1x128xf32>
    %cst = arith.constant 5.000000e-01 : f32
    %7 = vector.broadcast %cst : f32 to vector<1x128xf32>
    %8 = arith.cmpf ogt, %6, %7 : vector<1x128xf32>
    %9 = vector.shape_cast %8 : vector<1x128xi1> to vector<1x128xi1>
    %10 = vector.broadcast %9 : vector<1x128xi1> to vector<8x128xi1>
    %11 = vector.shape_cast %2 : vector<8x1xf32> to vector<8x1xf32>
    %12 = vector.broadcast %11 : vector<8x1xf32> to vector<8x128xf32>
    %13 = vector.shape_cast %1 : vector<8x1xf32> to vector<8x1xf32>
    %14 = vector.broadcast %13 : vector<8x1xf32> to vector<8x128xf32>
    %15 = arith.select %10, %12, %14 : vector<8x128xi1>, vector<8x128xf32>
    %16 = vector.broadcast %4 : vector<1x128xf32> to vector<8x128xf32>
    %17 = arith.mulf %15, %16 : vector<8x128xf32>
    %18 = vector.broadcast %5 : vector<1x128xf32> to vector<8x128xf32>
    %19 = arith.addf %17, %18 : vector<8x128xf32>
    %20 = math.sin %19 : vector<8x128xf32>
    %c0_3 = arith.constant 0 : index
    %c0_4 = arith.constant 0 : index
    %21 = vector.load %arg3[%c0_3, %c0_4] : memref<8x128xf32, #tpu.memory_space<vmem>>, vector<8x128xf32>
    tpu.vector_store %arg3[%c0_3, %c0_4], %20 {strides = array<i32>} : memref<8x128xf32, #tpu.memory_space<vmem>>, vector<8x128xf32>,
    return
  }
  func.func @transform_0(%arg0: i32) -> (i32, i32) {
    %c0_i32 = arith.constant 0 : i32
    %c0_i32_0 = arith.constant 0 : i32
    return %arg0, %c0_i32 : i32, i32
  }
  func.func @transform_1(%arg0: i32) -> (i32, i32) {
    %c0_i32 = arith.constant 0 : i32
    %c0_i32_0 = arith.constant 0 : i32
    %c0_i32_1 = arith.constant 0 : i32
    return %c0_i32, %c0_i32_0 : i32, i32
  }
  func.func @transform_2(%arg0: i32) -> (i32, i32) {
    %c0_i32 = arith.constant 0 : i32
    %c0_i32_0 = arith.constant 0 : i32
    return %arg0, %c0_i32 : i32, i32
  }
}

</mosaic_0001>

<bundles_post_ra>
// kernel: tpu_custom_call.1
= control target key start
LH: loop header
LB: loop body
LE: loop exit
PB: predicated region body
PF: predicated region fallthrough
CT: control target
= control target key end

     0   :  { %7 = vsyncpa [#allocation3], 0  ;;  %s629_s0 = inlined_call_operand.vmem [shape: f32[16,2], index: 0, kind: input, shape index: {}]   ;;  %s630_s1 = inlined_call_operand.vmem [shape: f32[3,128], index: 1, kind: input, shape index: {}]   ;;  %s631_s2 = inlined_call_operand.hbm [shape: f32[16,128], index: 2, kind: output, shape index: {}]  }
   0x1   :  { %9 = vsyncpa [#allocation3 + $0x1], 0  ;;  %s505_s9 = smov 0   ;;  %s507_s10 = smov 0  }
   0x2   :  { %s509_s11 = smov 0   ;;  %s511_s12 = smov 0  }
   0x3 LB: > { %s526_s13 = sadd.s32 4294967295, %s479_s12   ;;  %s346_s14 = sadd.s32 4294967294, %s479_s12   ;;  %s479_s12 = sphi %s511_s12, %s637_s12   ;;  %s475_s11 = sphi %s509_s11, %s636_s11   ;;  %s471_s10 = sphi %s507_s10, %s635_s10   ;;  %s467_s9 = sphi %s505_s9, %s634_s9  }
   0x4   : > { %s530_s15 = sadd.s32 1, %s479_s12   ;;  %s69_s16 = sadd.s32 1, %s475_s11 }
   0x5   : > { %s66_s17 = ssub.s32 %s479_s12, %s530_s15  ;;  %p79_p0 = scmp.ne.s32.totalorder %s475_s11, %s471_s10 }
   0x6   : > { %p67_p1 = scmp.eq.s32.totalorder %s66_s17, 0  ;;  %p80_p2 = scmp.eq.s32.totalorder %s526_s13, 1 }
   0x7   : > { %p85_p3 = scmp.ne.s32.totalorder %s471_s10, %s467_s9  ;;  %p86_p4 = scmp.eq.s32.totalorder %s346_s14, 1 }
   0x8   : > { %s541_s18 = scalar_select %p67_p1, %s475_s11, %s69_s16  }
   0x9   : > { %p543_p5 = por %p80_p2, %p79_p0  ;;  %p547_p6 = por %p86_p4, %p85_p3 }
   0xa   : > { %p349_p7 = scmp.ge.s32.totalorder %s479_s12, 1  ;;  %p114_p8 = scmp.lt.s32.totalorder %s479_s12, 3 }
   0xc   : > { %p115_p9 = pnand %p349_p7, %p114_p8 }
   0xd   : > { %p135_p10 = scmp.lt.s32.totalorder (!%p115_p9), %s526_s13, 1  ;;  %v481_v0 = vmov (!%p115_p9), 1   ;;  %v482_v2 = vmov (!%p115_p9), 0   ;;  %v143_v3 = vlaneseq (!%p115_p9)  ;;  %v140_v4 = vld [vmem:[%s630_s1] sm:$0x7] (!%p115_p9)  ;;  %s132_s28 = sand.u32 (!%p115_p9), 1, %s471_s10  }
   0xe   : > { %118 = sbr.rel (%p115_p9) target bundleno = 257 (0x101), region = 28  ;;  %411 = vset.pattern.permute.xlu0 (!%p115_p9), %v481_v0  ;;  %vm141_vm0 = vcmp.gt.f32.partialorder (!%p115_p9), %v140_v4, 0.5  ;;  %v483_v29 = vmov (!%p115_p9), 2102212464   ;;  %v484_v31 = vmov (!%p115_p9), 920167782  }
   0xf   : > { %v144_v5 = vshrl.u32 (!%p115_p9), %v143_v3, 7  ;;  %v142_v7 = vsel (!%p115_p9), %vm141_vm0, 1, %v482_v2  ;;  %v485_v35 = vmov (!%p115_p9), 1326507024   ;;  %v486_v37 = vmov (!%p115_p9), 683565275  }
  0x10   : > { %v487_v39 = vmov (!%p115_p9), 2475754826   ;;  %v488_v42 = vmov (!%p115_p9), 2131351028   ;;  %s350_s29 = sshll.u32 (!%p115_p9), %s132_s28, 3  ;;  %s357_s30 = sshll.u32 (!%p115_p9), %s526_s13, 7 }
  0x11   : > { %v145_v6 = vsub.s32 (!%p115_p9), 2, %v144_v5  ;;  %v160_v9 = vsub.s32 (!%p115_p9), 0, %v144_v5  ;;  %v165_v11 = vsub.s32 (!%p115_p9), 1, %v144_v5  ;;  %s134_s3 = scalar_lea.vmem (!%p115_p9), [#allocation2], %s350_s29  ;;  %s587_s7 = scalar_lea.hbm (!%p115_p9), %s631_s2, %s357_s30 }
  0x12   : > { %s287_s4 = sshll.u32 (!%p115_p9), %s134_s3, 4  ;;  %s274_s8 = scalar_lea.sflag (!%p115_p9), [#allocation3], %s132_s28  ;;  %s589_s4 = int_to_ptr.vmem [resolvable:$true] %s287_s4 }
  0x13   : > { %v146_v8 = vrot.slane (!%p115_p9), %v142_v7, %v145_v6  ;;  %v161_v12 = vrot.slane (!%p115_p9), %v140_v4, %v160_v9  ;;  %v166_v13 = vrot.slane (!%p115_p9), %v140_v4, %v165_v11  ;;  %s489_s14 = smov (!%p115_p9), [#allocation2]  }
  0x14   : > { %s421_s16 = sshll.u32 (!%p115_p9), %s489_s14, 4  ;;  %s422_s16 = int_to_ptr.vmem [resolvable:$false] %s421_s16 }
  0x15   : > { %s136_s21 = scalar_select %p135_p10, %s526_s13, 1  ;;  %vm147_vm1 = vcmp.eq.s32.totalorder %v146_v8, 1 }
  0x16   : > { %s417_s13 = scalar_lea.vmem %s589_s4, 128  ;;  %s423_s17 = scalar_lea.vmem %s422_s16, 256 }
  0x17   : > { %s351_s22 = sshll.u32 %s136_s21, 3  ;;  %p418_p11 = scmp.ne.s32.totalorder %s589_s4, %s417_s13 }
  0x18   : > { %s138_s25 = scalar_lea.vmem %s629_s0, %s351_s22  ;;  %p424_p0 = scmp.lt.s32.totalorder %s589_s4, %s422_s16 }
  0x19   : > { %v139_v1 = vld [vmem:[%s138_s25] sm:$0xff]  ;;  %p419_p12 = pnand %p418_p11, %p543_p5  ;;  %p425_p1 = scmp.lt.s32.totalorder %s423_s17, %s417_s13 }
  0x1a   : > { %150 = vperm.xlu0 %411, %v139_v1  }
  0x1b   : > { %p420_p13 = pneg %p419_p12  ;;  %p426_p2 = por %p425_p1, %p424_p0 }
  0x1d   : > { %p427_p3 = pnand %p426_p2, %p420_p13 }
  0x1e   : > { %412 = vset.pattern.permute.xlu0 %v482_v2 }
  0x1f   : > { %154 = vperm.xlu0 %412, %v139_v1  }
  0x99   : > { %v151_v10 = vpop.permute.xlu0 %150 }
  0x9e   : > { %v155_v14 = vpop.permute.xlu0 %154 }
  0x9f   : > { %v157_v15 = vsel %vm147_vm1, %v151_v10, %v155_v14 }
  0xa0   : > { %v162_v16 = vmul.f32 %v161_v12, %v157_v15 }
  0xa2   : > { %v561_v17 = vadd.f32 %v166_v13, %v162_v16 }
  0xa4   : > { %v171_v18 = vand.u32 2139095040, %v561_v17  ;;  %v168_v19 = vand.u32 2147483647, %v561_v17  ;;  %vm170_vm9 = vcmp.lt.s32.totalorder %v561_v17, 0  ;;  %vm260_vm14 = vweird.f32 %v561_v17 }
  0xa6   : > { %v172_v20 = vshrl.u32 %v171_v18, 23  ;;  %v175_v22 = vand.u32 8388607, %v168_v19  ;;  %vm169_vm10 = vcmp.le.f32.partialorder %v168_v19, 0.7853982 }
  0xa8   : > { %v352_v21 = vadd.s32 4294967169, %v172_v20  ;;  %v176_v25 = vor.u32 8388608, %v175_v22 }
  0xaa   : > { %v178_v23 = vadd.s32 1, %v352_v21  ;;  %v216_v33 = vshll.u32 %v176_v25, 8 }
  0xac   : > { %vm179_vm2 = vcmp.gt.s32.totalorder %v178_v23, 0 }
  0xad   : > { %v180_v24 = vsel %vm179_vm2, %v178_v23, 0 }
  0xae   : > { %v182_v26 = vand.u32 31, %v180_v24  ;;  %v181_v27 = vshrl.u32 %v180_v24, 5 }
  0xb0   : > { %v183_v28 = vsub.s32 32, %v182_v26  ;;  %v194_v30 = vshll.u32 %v483_v29, %v182_v26  ;;  %v197_v32 = vshll.u32 %v484_v31, %v182_v26  ;;  %v185_v38 = vshll.u32 %v486_v37, %v182_v26 }
  0xb1   : > { %v188_v41 = vshll.u32 %v487_v39, %v182_v26  ;;  %v191_v44 = vshll.u32 %v488_v42, %v182_v26  ;;  %vm203_vm3 = vcmp.lt.s32.totalorder %v181_v27, 4  ;;  %vm200_vm4 = vcmp.lt.s32.totalorder %v181_v27, 1 }
  0xb2   : > { %v195_v34 = vshrl.u32 %v484_v31, %v183_v28  ;;  %v198_v36 = vshrl.u32 %v485_v35, %v183_v28  ;;  %v186_v40 = vshrl.u32 %v487_v39, %v183_v28  ;;  %v189_v43 = vshrl.u32 %v488_v42, %v183_v28 }
  0xb3   : > { %v192_v45 = vshrl.u32 %v483_v29, %v183_v28  ;;  %v184_v49 = vshrl.u32 %v486_v37, %v183_v28  ;;  %vm201_vm5 = vcmp.lt.s32.totalorder %v181_v27, 2  ;;  %vm202_vm6 = vcmp.lt.s32.totalorder %v181_v27, 3 }
  0xb4   : > { %v196_v46 = vor.u32 %v195_v34, %v194_v30  ;;  %v199_v47 = vor.u32 %v198_v36, %v197_v32  ;;  %v187_v48 = vor.u32 %v186_v40, %v185_v38  ;;  %v190_v50 = vor.u32 %v189_v43, %v188_v41 }
  0xb5   : > { %v193_v51 = vor.u32 %v192_v45, %v191_v44 }
  0xb6   : > { %v209_v52 = vsel %vm203_vm3, %v196_v46, 920167782  ;;  %v213_v53 = vsel %vm203_vm3, %v199_v47, 1326507024  ;;  %v208_v55 = vsel %vm200_vm4, %v187_v48, %v190_v50  ;;  %v204_v58 = vsel %vm200_vm4, %v184_v49, %v187_v48 }
  0xb7   : > { %v205_v54 = vsel %vm203_vm3, %v193_v51, 2102212464  ;;  %v210_v56 = vsel %vm202_vm6, %v193_v51, %v209_v52  ;;  %v212_v57 = vsel %vm200_vm4, %v190_v50, %v193_v51  ;;  %v214_v61 = vsel %vm202_vm6, %v196_v46, %v213_v53 }
  0xb8   : > { %v206_v59 = vsel %vm202_vm6, %v190_v50, %v205_v54  ;;  %v211_v60 = vsel %vm201_vm5, %v208_v55, %v210_v56  ;;  %v215_v62 = vsel %vm201_vm5, %v212_v57, %v214_v61 }
  0xb9   : > { %v567_v63 = vmul.u32.u64.low %v216_v33, %v211_v60  ;;  %v568_v0 = vmul.u32.u64.high %v216_v33, %v211_v60, %v567_v63  ;;  %v570_v1 = vmul.u32.u64.low %v216_v33, %v215_v62  ;;  %v571_v2 = vmul.u32.u64.high %v216_v33, %v215_v62, %v570_v1 }
  0xba   : > { %v207_v3 = vsel %vm201_vm5, %v204_v58, %v206_v59 }
  0xbb   : > { %v226_v4 = vadd.s32 1, %v568_v0  ;;  %v223_v5 = vmul.u32 %v216_v33, %v207_v3  ;;  %vm225_vm7 = vc.u32 %v571_v2, %v567_v63  ;;  %v224_v18 = vadd.s32 %v567_v63, %v571_v2 }
  0xbd   : > { %v227_v6 = vsel %vm225_vm7, %v226_v4, %v568_v0 }
  0xbe   : > { %v228_v7 = vadd.s32 %v227_v6, %v223_v5 }
  0xc0   : > { %v229_v8 = vadd.s32 536870912, %v228_v7 }
  0xc2   : > { %v230_v9 = vshrl.u32 %v229_v8, 30 }
  0xc4   : > { %v231_v10 = vshll.u32 %v230_v9, 30  ;;  %v254_v31 = vsub.s32 4, %v230_v9 }
  0xc6   : > { %v232_v11 = vsub.s32 %v228_v7, %v231_v10  ;;  %v255_v34 = vsel %vm170_vm9, %v254_v31, %v230_v9 }
  0xc7   : > { %v257_v36 = vsel %vm169_vm10, 0, %v255_v34 }
  0xc8   : > { %v234_v12 = vsub.s32 0, %v232_v11  ;;  %v261_v37 = vadd.s32 3, %v257_v36 }
  0xca   : > { %v353_v13 = vmin.u32 %v234_v12, %v232_v11  ;;  %v262_v38 = vand.u32 3, %v261_v37 }
  0xcc   : > { %v236_v14 = vclz %v353_v13  ;;  %vm267_vm11 = vcmp.eq.s32.totalorder %v262_v38, 2  ;;  %vm264_vm12 = vcmp.eq.s32.totalorder %v262_v38, 0  ;;  %vm263_vm13 = vcmp.lt.s32.totalorder %v262_v38, 2 }
  0xce   : > { %v354_v15 = vadd.s32 4294967294, %v236_v14 }
  0xd0   : > { %vm355_vm8 = vcmp.lt.s32.totalorder %v354_v15, 0 }
  0xd1   : > { %v239_v16 = vsel %vm355_vm8, 0, %v354_v15 }
  0xd2   : > { %v240_v20 = vsub.s32 32, %v239_v16  ;;  %v244_v21 = vsub.s32 4294967266, %v239_v16  ;;  %v241_v22 = vshll.u32 %v232_v11, %v239_v16 }
  0xd4   : > { %v242_v23 = vshrl.u32 %v224_v18, %v240_v20  ;;  %v245_v24 = vadd.s32 127, %v244_v21 }
  0xd6   : > { %v243_v25 = vor.u32 %v242_v23, %v241_v22  ;;  %v246_v26 = vshll.u32 %v245_v24, 23 }
  0xd8   : > { %v247_v27 = vor.u32 4788187, %v246_v26  ;;  %v250_v29 = vcvt.s32.f32 %v243_v25 }
  0xda   : > { %v248_v28 = vand.u32 2147483647, %v247_v27 }
  0xdc   : > { %v251_v30 = vmul.f32 %v250_v29, %v248_v28 }
  0xde   : > { %v252_v32 = vxor.u32 2147483648, %v251_v30 }
  0xe0   : > { %v253_v33 = vsel %vm170_vm9, %v252_v32, %v251_v30 }
  0xe1   : > { %v256_v35 = vsel %vm169_vm10, %v561_v17, %v253_v33 }
  0xe2   : > { %413 = vcosq.f32 %v256_v35 }
  0xe3   : > { %415 = vsinq.f32 %v256_v35 }
  0xec   : > { %v414_v39 = vpop.eup %413 }
  0xed   : > { %v416_v40 = vpop.eup %415  ;;  %v268_v41 = vxor.u32 2147483648, %v414_v39 }
  0xee   : > { %v265_v42 = vxor.u32 2147483648, %v416_v40 }
  0xef   : > { %v269_v19 = vsel %vm267_vm11, %v268_v41, %v416_v40 }
  0xf0   : > { %v266_v43 = vsel %vm264_vm12, %v414_v39, %v265_v42 }
  0xf1   : > { %v270_v44 = vsel %vm263_vm13, %v266_v43, %v269_v19 }
  0xf2   : > { %v271_v45 = vsel %vm260_vm14, nan, %v270_v44 }
  0xf3   : > { %272 = vst [vmem:[%s134_s3] sm:$0xff] %v271_v45 }
  0xf4   : > { %430 = shalt.err (!%p427_p3)
}
  0xf5   : > { %s431_s21 = scalar_lea.hbm %s587_s7, 128  ;;  %s435_s24 = scalar_lea.hbm %s631_s2, 256 }
  0xf6   : > { %p432_p4 = scmp.ne.s32.totalorder %s587_s7, %s431_s21  ;;  %p436_p9 = scmp.lt.u32.totalorder %s587_s7, %s631_s2 }
  0xf7   : > { %p437_p10 = scmp.lt.u32.totalorder %s435_s24, %s431_s21  ;;  %p439_p12 = scmp.lt.u32.totalorder %s431_s21, %s587_s7 }
  0xf8   : > { %p433_p7 = pnand %p432_p4, %p543_p5 }
  0xf9   : > { %p438_p11 = por %p437_p10, %p436_p9 }
  0xfa   : > { %p434_p8 = pneg %p433_p7 }
  0xfb   : > { %p440_p13 = por %p439_p12, %p438_p11 }
  0xfd   : > { %p441_p0 = pnand %p440_p13, %p434_p8 }
  0xff   : > { %444 = shalt.err (!%p441_p0)
}
 0x100   : > { %364 = dma.vmem_to_hbm [thread:$0]  (%p543_p5), %s589_s4, 128, %s587_s7, %s274_s8  }
 0x101 PF: > { %p370_p1 = scmp.ge.s32.totalorder %s479_s12, 2  ;;  %s299_s27 = sand.u32 1, %s467_s9  }
 0x102   : > { %s300_s28 = scalar_lea.sflag [#allocation3], %s299_s27 }
 0x103   : > { %p367_p2 = pnand %p370_p1, %p547_p6 }
 0x105   : > { %462 = dma.done.wait (!%p367_p2), %s300_s28, 128  }
 0x106   : > { %464 = vsyncadd (!%p367_p2), %s300_s28, 4294967168  ;;  %p12_p3 = scmp.ge.s32.totalorder %s530_s15, 4   ;;  %s634_s9 = smov %s471_s10 }
 0x107   : > { %s635_s10 = smov %s475_s11  ;;  %s636_s11 = smov %s541_s18 }
 0x108   : > { %s637_s12 = smov %s530_s15  ;;  %14 = sbr.rel (!%p12_p3) target bundleno = 3 (0x3), region = 63 }
 0x10f   :  { %305 = vsyncpa [#allocation3], 1 }
 0x110   :  { %307 = vsyncpa [#allocation3 + $0x1], 1 }

</bundles_post_ra>
